<compile_context>
chip_gen: v6e
topology: v6e:2x2x1
jax: 0.10.0
libtpu: 0.0.40
codegen_flags: <defaults>
</compile_context>

<pallas_src>
import functools

import jax
import jax.numpy as jnp
from jax.experimental import pallas as pl
from jax.experimental.pallas import tpu as pltpu


def _round_up(n, m):
    return ((n + m - 1) // m) * m


def _rnn5_kernel(x_ref, w_ref, b_ref, o_ref, *, approx_recip=False):
    # x: (TM, In), w: (In, Out_p), b: (8, Out_p), o: (TM, Out_p)
    logits = jnp.dot(x_ref[...], w_ref[...],
                     preferred_element_type=jnp.float32)
    logits = logits + b_ref[0:1, :]          # (1, Out_p) broadcast row add
    # Numerically-stable softmax over the last dim, all in f32.
    m = jnp.max(logits, axis=-1, keepdims=True)
    e = jnp.exp(logits - m)
    denom = jnp.sum(e, axis=-1, keepdims=True)
    if approx_recip:
        # EUP vrcp slot (cheap) but ~1e-4 rel error -- opt-in only.
        p = e * pl.reciprocal(denom, approx=True)
    else:
        p = e / denom                        # exact f32 division (default)
    o_ref[...] = p.astype(o_ref.dtype)


def prepare_params(w, b, *, matmul_dtype=None):
    """One-time parameter prep (do at init, cache the result).

    w: (In, Out) -- transposed PyTorch l1.weight.  b: (Out,).
    Returns (w_p, b_p, out_features):
      w_p: (In, Out_p) padded with zero columns to Out_p = round_up(Out, 128),
           optionally cast to `matmul_dtype` (e.g. bf16).
      b_p: (8, Out_p) f32, padded columns = -inf so padded logits contribute
           exp(-inf) = 0 to the softmax; broadcast to a native (8, 128) tile.
    """
    In, Out = w.shape
    Out_p = _round_up(Out, 128)
    pad = Out_p - Out
    if pad:
        w_p = jnp.concatenate([w, jnp.zeros((In, pad), dtype=w.dtype)], axis=1)
        b_p = jnp.concatenate(
            [b, jnp.full((pad,), -jnp.inf, dtype=b.dtype)], axis=0)
    else:
        w_p, b_p = w, b
    if matmul_dtype is not None:
        w_p = w_p.astype(matmul_dtype)
    b_p = jnp.broadcast_to(
        b_p.astype(jnp.float32).reshape(1, Out_p), (8, Out_p))
    return w_p, b_p, Out


def rnn5_forward(x, w_p, b_p, out_features, *, block_m=512,
                 approx_recip=False, out_dtype=jnp.float32):
    """out = softmax(x @ W + b, axis=-1) with prepared (padded) params.

    x: (B, In).  w_p: (In, Out_p) prepared weight.  b_p: (8, Out_p) prepared
    bias.  Returns (B, out_features) in `out_dtype`.
    """
    B, In = x.shape
    In_w, Out_p = w_p.shape
    assert In_w == In, (In_w, In)

    # Cast x once in the wrapper so the HBM->VMEM DMA moves the narrow dtype.
    if x.dtype != w_p.dtype:
        x = x.astype(w_p.dtype)
    x_item = jnp.dtype(x.dtype).itemsize
    w_item = jnp.dtype(w_p.dtype).itemsize
    o_item = jnp.dtype(out_dtype).itemsize

    # --- Batch tiling: minimize padding waste, multiple of 8 (f32 sublane). ---
    B8 = _round_up(B, 8)
    n_tiles = pl.cdiv(B8, block_m)
    TM = _round_up(pl.cdiv(B8, n_tiles), 8)

    # --- VMEM-aware cap (v7x has 64 MiB total; v5e/v6e 128 MiB). ---
    def footprint(tm):
        tiles = 2 * tm * (In * x_item + Out_p * o_item)   # x + out, 2 buffers
        resident = In * Out_p * w_item + 8 * Out_p * 4     # weight + bias
        return tiles + resident

    VMEM_BUDGET = 24 * 1024 * 1024
    while TM > 8 and footprint(TM) > VMEM_BUDGET:
        TM = max(8, _round_up(TM // 2, 8))
    # TODO(synk): if the resident weight alone blows the budget (huge In*Out_p),
    # switch to an online-softmax variant with an "arbitrary" grid axis over Out.

    n_tiles = pl.cdiv(B8, TM)
    B_p = TM * n_tiles
    if B_p != B:
        x = jnp.concatenate(
            [x, jnp.zeros((B_p - B, In), dtype=x.dtype)], axis=0)

    # Raise the scoped VMEM limit only when the default (16 MiB on v5e) binds.
    fp = footprint(TM)
    vmem_limit = None
    if fp > 12 * 1024 * 1024:
        vmem_limit = int(min(max(fp + 8 * 1024 * 1024, 32 * 1024 * 1024),
                             56 * 1024 * 1024))

    # Grid-invariant weight/bias: single buffer (no point double-buffering).
    const_kwargs = {}
    if hasattr(pl, "Buffered"):
        const_kwargs = dict(pipeline_mode=pl.Buffered(1))

    cost = pl.CostEstimate(
        flops=2 * B_p * In * Out_p,
        transcendentals=B_p * Out_p,
        bytes_accessed=(B_p * In * x_item + In * Out_p * w_item
                        + 8 * Out_p * 4 + B_p * Out_p * o_item),
    )

    out_p = pl.pallas_call(
        functools.partial(_rnn5_kernel, approx_recip=approx_recip),
        out_shape=jax.ShapeDtypeStruct((B_p, Out_p), out_dtype),
        grid_spec=pltpu.PrefetchScalarGridSpec(
            num_scalar_prefetch=0,
            grid=(n_tiles,),
            in_specs=[
                # x tiles march over the batch; weight/bias stay VMEM-resident.
                pl.BlockSpec((TM, In), lambda i: (i, 0)),
                pl.BlockSpec((In, Out_p), lambda i: (0, 0), **const_kwargs),
                pl.BlockSpec((8, Out_p), lambda i: (0, 0), **const_kwargs),
            ],
            out_specs=pl.BlockSpec((TM, Out_p), lambda i: (i, 0)),
        ),
        compiler_params=pltpu.CompilerParams(
            dimension_semantics=("parallel",),   # batch axis is independent
            vmem_limit_bytes=vmem_limit,
        ),
        cost_estimate=cost,
    )(x, w_p, b_p)

    return out_p[:B, :out_features]


def init_params(key, input_size, output_size):
    """Deterministic init mimicking nn.Linear's uniform(-1/sqrt(in), 1/sqrt(in))."""
    k1, k2, k3, k4 = jax.random.split(key, 4)
    bound1 = 1.0 / (input_size ** 0.5)
    # l1: PyTorch weight is (out, in); stored transposed (in, out) for x @ W.
    w1 = jax.random.uniform(k1, (input_size, output_size), jnp.float32,
                            -bound1, bound1)
    b1 = jax.random.uniform(k2, (output_size,), jnp.float32, -bound1, bound1)
    # self.softmax Linear exists in __init__ but is unused in forward.
    bound2 = 1.0 / (output_size ** 0.5)
    w2 = jax.random.uniform(k3, (output_size, output_size), jnp.float32,
                            -bound2, bound2)
    b2 = jax.random.uniform(k4, (output_size,), jnp.float32, -bound2, bound2)
    return (w1, b1), (w2, b2)


if __name__ == "__main__":
    input_size = 32
    output_size = 16
    batch = 8

    key = jax.random.PRNGKey(0)
    kx, kp = jax.random.split(key)
    x = jax.random.normal(kx, (batch, input_size), dtype=jnp.float32)
    (w1, b1), _unused_softmax_linear = init_params(kp, input_size, output_size)

    # One-time param prep (f32 kept here to satisfy the tight accuracy check;
    # pass matmul_dtype=jnp.bfloat16 for the half-bandwidth inference path).
    w_p, b_p, out_features = prepare_params(w1, b1, matmul_dtype=None)

    out = rnn5_forward(x, w_p, b_p, out_features)
    out = jax.block_until_ready(out)

    # Sanity: reference in plain JAX.
    ref = jax.nn.softmax(x @ w1 + b1, axis=-1)
    assert out.shape == (batch, output_size)
    assert jnp.allclose(out, ref, atol=1e-4, rtol=1e-4), (
        float(jnp.max(jnp.abs(out - ref))))
    print("KERNEL_OK")
</pallas_src>

<mosaic_0001>
module attributes {stable_mosaic.version = 11 : i64} {
  func.func @_rnn5_kernel(%arg0: i32, %arg1: memref<8x32xf32, #tpu.memory_space<vmem>>, %arg2: memref<32x128xf32, #tpu.memory_space<vmem>>, %arg3: memref<8x128xf32, #tpu.memory_space<vmem>>, %arg4: memref<8x128xf32, #tpu.memory_space<vmem>>) attributes {dimension_semantics = [#tpu.dimension_semantics<parallel>], iteration_bounds = array<i64: 1>, scalar_prefetch = 0 : i64, scratch_operands = 0 : i64, tpu.core_type = #tpu.core_type<tc>, window_params = [{transform_indices = @transform_0, window_bounds = array<i64: 8, 32>}, {pipeline_mode = #tpu.pipeline_mode<synchronous>, transform_indices = @transform_1, window_bounds = array<i64: 32, 128>}, {pipeline_mode = #tpu.pipeline_mode<synchronous>, transform_indices = @transform_2, window_bounds = array<i64: 8, 128>}, {transform_indices = @transform_3, window_bounds = array<i64: 8, 128>}]} {
    %c0 = arith.constant 0 : index
    %c0_0 = arith.constant 0 : index
    %0 = vector.load %arg1[%c0, %c0_0] : memref<8x32xf32, #tpu.memory_space<vmem>>, vector<8x32xf32>
    %c0_1 = arith.constant 0 : index
    %c0_2 = arith.constant 0 : index
    %1 = vector.load %arg2[%c0_1, %c0_2] : memref<32x128xf32, #tpu.memory_space<vmem>>, vector<32x128xf32>
    %cst = arith.constant dense<0.000000e+00> : vector<8x128xf32>
    %2 = tpu.matmul %0, %1, %cst {dimension_numbers = #tpu.dot_dimension_numbers<[1], [0], [0], [1], [0, 0, 1, 1], [], []>} : vector<8x32xf32>, vector<32x128xf32>, vector<8x128xf32> -> vector<8x128xf32>
    %c0_3 = arith.constant 0 : index
    %c0_4 = arith.constant 0 : index
    %3 = vector.load %arg3[%c0_3, %c0_4] : memref<8x128xf32, #tpu.memory_space<vmem>>, vector<1x128xf32>
    %4 = vector.broadcast %3 : vector<1x128xf32> to vector<8x128xf32>
    %5 = arith.addf %2, %4 : vector<8x128xf32>
    %cst_5 = arith.constant dense<0xFF800000> : vector<8xf32>
    %6 = vector.multi_reduction <maximumf>, %5, %cst_5 [1] : vector<8x128xf32> to vector<8xf32>
    %7 = vector.shape_cast %6 : vector<8xf32> to vector<8x1xf32>
    %8 = vector.broadcast %7 : vector<8x1xf32> to vector<8x128xf32>
    %9 = arith.subf %5, %8 : vector<8x128xf32>
    %10 = math.exp %9 : vector<8x128xf32>
    %cst_6 = arith.constant dense<0.000000e+00> : vector<8xf32>
    %11 = vector.multi_reduction <add>, %10, %cst_6 [1] : vector<8x128xf32> to vector<8xf32>
    %12 = vector.shape_cast %11 : vector<8xf32> to vector<8x1xf32>
    %13 = vector.broadcast %12 : vector<8x1xf32> to vector<8x128xf32>
    %14 = arith.divf %10, %13 : vector<8x128xf32>
    %c0_7 = arith.constant 0 : index
    %c0_8 = arith.constant 0 : index
    %15 = vector.load %arg4[%c0_7, %c0_8] : memref<8x128xf32, #tpu.memory_space<vmem>>, vector<8x128xf32>
    tpu.vector_store %arg4[%c0_7, %c0_8], %14 {strides = array<i32>} : memref<8x128xf32, #tpu.memory_space<vmem>>, vector<8x128xf32>,
    return
  }
  func.func @transform_0(%arg0: i32) -> (i32, i32) {
    %c0_i32 = arith.constant 0 : i32
    %c0_i32_0 = arith.constant 0 : i32
    return %arg0, %c0_i32 : i32, i32
  }
  func.func @transform_1(%arg0: i32) -> (i32, i32) {
    %c0_i32 = arith.constant 0 : i32
    %c0_i32_0 = arith.constant 0 : i32
    %c0_i32_1 = arith.constant 0 : i32
    return %c0_i32, %c0_i32_0 : i32, i32
  }
  func.func @transform_2(%arg0: i32) -> (i32, i32) {
    %c0_i32 = arith.constant 0 : i32
    %c0_i32_0 = arith.constant 0 : i32
    %c0_i32_1 = arith.constant 0 : i32
    return %c0_i32, %c0_i32_0 : i32, i32
  }
  func.func @transform_3(%arg0: i32) -> (i32, i32) {
    %c0_i32 = arith.constant 0 : i32
    %c0_i32_0 = arith.constant 0 : i32
    return %arg0, %c0_i32 : i32, i32
  }
}

</mosaic_0001>

<bundles_post_ra>
// kernel: tpu_custom_call.1
= control target key start
LH: loop header
LB: loop body
LE: loop exit
PB: predicated region body
PF: predicated region fallthrough
CT: control target
= control target key end

     0   :  { %8 = vsyncpa [#allocation3], 0  ;;  %s318_s0 = inlined_call_operand.hbm [shape: f32[8,32], index: 0, kind: input, shape index: {}]   ;;  %s319_s1 = inlined_call_operand.hbm [shape: f32[32,128], index: 1, kind: input, shape index: {}]   ;;  %s320_s2 = inlined_call_operand.hbm [shape: f32[8,128], index: 2, kind: input, shape index: {}]   ;;  %s321_s3 = inlined_call_operand.hbm [shape: f32[8,128], index: 3, kind: output, shape index: {}]  }
   0x1   :  { %9 = vsyncpa [#allocation6], 0 }
   0x2   :  { %10 = vsyncpa [#allocation4], 0  ;;  %s278_s12 = smov [#allocation5]  }
   0x3   :  { %s26_s13 = sshll.u32 %s278_s12, 4  ;;  %s27_s13 = int_to_ptr.vmem [resolvable:$true] %s26_s13 }
   0x4   :  { %s200_s14 = scalar_lea.vmem %s27_s13, 512  ;;  %p205_p1 = scmp.lt.s32.totalorder %s27_s13, %s27_s13 }
   0x5   :  { %p201_p0 = scmp.ne.s32.totalorder %s27_s13, %s200_s14  ;;  %p206_p2 = scmp.lt.s32.totalorder %s200_s14, %s200_s14 }
   0x7   :  { %p207_p3 = por %p206_p2, %p205_p1 }
   0x9   :  { %p208_p4 = pnand %p207_p3, %p201_p0 }
   0xb   :  { %211 = shalt.err (!%p208_p4)
}
   0xc   :  { %s279_s15 = smov 128   ;;  %s280_s16 = smov 8  }
   0xd   :  { %32 = dma.hbm_to_vmem [thread:$0]  %s319_s1, 512, %s27_s13, [#allocation6], %s279_s15, %s279_s15, %s280_s16  }
   0xe   :  { %s281_s19 = smov [#allocation2]   ;;  %s282_s21 = smov [#allocation7]  }
   0xf   :  { %s17_s20 = sshll.u32 %s281_s19, 4  ;;  %s39_s22 = sshll.u32 %s282_s21, 4  ;;  %s18_s20 = int_to_ptr.vmem [resolvable:$true] %s17_s20  ;;  %s40_s22 = int_to_ptr.vmem [resolvable:$true] %s39_s22 }
  0x10   :  { %s220_s23 = scalar_lea.vmem %s18_s20, 128  ;;  %p225_p6 = scmp.lt.s32.totalorder %s18_s20, %s18_s20 }
  0x11   :  { %p221_p5 = scmp.ne.s32.totalorder %s18_s20, %s220_s23  ;;  %p226_p7 = scmp.lt.s32.totalorder %s220_s23, %s220_s23 }
  0x13   :  { %p227_p8 = por %p226_p7, %p225_p6 }
  0x15   :  { %p228_p9 = pnand %p227_p8, %p221_p5 }
  0x17   :  { %231 = shalt.err (!%p228_p9)
}
  0x18   :  { %20 = dma.hbm_to_vmem [thread:$0]  %s318_s0, 128, %s18_s20, [#allocation3]  }
  0x19   :  { %s240_s26 = scalar_lea.vmem %s40_s22, 128  ;;  %p245_p11 = scmp.lt.s32.totalorder %s40_s22, %s40_s22 }
  0x1a   :  { %p241_p10 = scmp.ne.s32.totalorder %s40_s22, %s240_s26  ;;  %p246_p12 = scmp.lt.s32.totalorder %s240_s26, %s240_s26 }
  0x1c   :  { %p247_p13 = por %p246_p12, %p245_p11 }
  0x1e   :  { %p248_p0 = pnand %p247_p13, %p241_p10 }
  0x20   :  { %251 = shalt.err (!%p248_p0)
}
  0x21   :  { %42 = dma.hbm_to_vmem [thread:$0]  %s320_s2, 128, %s40_s22, [#allocation6]  }
  0x22   :  { %272 = dma.done.wait [#allocation3], 128  }
  0x23   :  { %273 = vsyncadd [#allocation3], 4294967168 }
  0x24   :  { %274 = dma.done.wait [#allocation6], 640  }
  0x25   :  { %275 = vsyncadd [#allocation6], 4294966656  ;;  %v283_v0 = vmov 0.0   ;;  %vm284_vm0 = vmmov 0   ;;  %v56_v1 = vld [vmem:[#allocation5 + $0x18] sm:$0xff]  ;;  %v55_v2 = vld [vmem:[#allocation5 + $0x10] sm:$0xff] }
  0x26   :  { %169 = vmatprep.subr.mxu0 %v283_v0  ;;  %177 = vmatprep.mubr.msk.f32.mxu0 %vm284_vm0, %v283_v0  ;;  %v54_v3 = vld [vmem:[#allocation5 + $0x8] sm:$0xff]  ;;  %v53_v4 = vld [vmem:[#allocation5] sm:$0xff]  ;;  %v52_v5 = vld [vmem:[#allocation2] sm:$0xff]  ;;  %vm62_vm1 = vcmask 261120   ;;  %s285_s0 = smov [#allocation8]  }
  0x27   :  { %170 = vmatpush3.msra.mxu0 %v56_v1  ;;  %v162_v6 = vld [vmem:[#allocation7] ss:$0 sm:$0xff]  ;;  %s152_s2 = sshll.u32 %s285_s0, 4  ;;  %s153_s2 = int_to_ptr.vmem [resolvable:$true] %s152_s2 }
  0x28   :  { %171 = vmatprep.subr.mxu0 %v283_v0  ;;  %s252_s28 = scalar_lea.vmem %s153_s2, 128  ;;  %p257_p2 = scmp.lt.s32.totalorder %s153_s2, %s153_s2 }
  0x29   :  { %172 = vmatpush3.msra.mxu0 %v55_v2  ;;  %p253_p1 = scmp.ne.s32.totalorder %s153_s2, %s252_s28  ;;  %p258_p3 = scmp.lt.s32.totalorder %s252_s28, %s252_s28 }
  0x2a   :  { %173 = vmatprep.subr.mxu0 %v283_v0 }
  0x2b   :  { %174 = vmatpush3.msra.mxu0 %v54_v3  ;;  %p259_p4 = por %p258_p3, %p257_p2 }
  0x2c   :  { %175 = vmatprep.subr.mxu0 %v283_v0 }
  0x2d   :  { %176 = vmatpush3.msra.mxu0 %v53_v4  ;;  %p260_p5 = pnand %p259_p4, %p253_p1 }
  0x2e   :  { %178 = vmatmul.mubr.msk.f32.vlgmr.msra.gmra.mxu0 %vm62_vm1, %v52_v5 }
  0xee   :  { %v132_v7 = vpop.f32.mrf.mxu0 }
  0xef   :  { %v133_v8 = vadd.f32 %v162_v6, %v132_v7 }
  0xf0   :  { %v179_v9 = vpop.f32.mrf.mxu0 }
  0xf1   :  { %136 = vmax.xlane.f32.xlu0 %v133_v8 }
 0x17a   :  { %v137_v10 = vpop.xlane.xlu0 %136 }
 0x17b   :  { %v138_v11 = vsub.f32 %v133_v8, %v137_v10 }
 0x17d   :  { %v139_v12 = vmul.f32 1.442695, %v138_v11 }
 0x17f   :  { %188 = vpow2.f32 %v139_v12 }
 0x18c   :  { %v189_v13 = vpop.eup %188 }
 0x18d   :  { %141 = vadd.xlane.f32.xlu0 %v189_v13 }
 0x216   :  { %v142_v14 = vpop.xlane.xlu0 %141 }
 0x217   :  { %190 = vrcp.f32 %v142_v14 }
 0x224   :  { %v191_v15 = vpop.eup %190 }
 0x225   :  { %v144_v16 = vmul.f32 %v191_v15, %v189_v13 }
 0x227   :  { %145 = vst [vmem:[#allocation8] sm:$0xff] %v144_v16 }
 0x228   :  { %263 = shalt.err (!%p260_p5)
}
 0x229   :  { %155 = dma.vmem_to_hbm [thread:$0]  %s153_s2, 128, %s321_s3, [#allocation4]  }
 0x22a   :  { %276 = dma.done.wait [#allocation4], 128  }
 0x22b   :  { %277 = vsyncadd [#allocation4], 4294967168 }
 0x22c   :  { %159 = vsyncpa [#allocation3], 1 }
 0x22d   :  { %160 = vsyncpa [#allocation6], 1 }
 0x22e   :  { %161 = vsyncpa [#allocation4], 1 }

</bundles_post_ra>
